<compile_context>
chip_gen: v5e
topology: v5e:2x2
jax: 0.10.0
libtpu: 0.0.40
codegen_flags: <defaults>
</compile_context>

<pallas_src>
import math

import jax
import jax.numpy as jnp
from jax.experimental import pallas as pl
from jax.experimental.pallas import tpu as pltpu


def _vmem_capacity_bytes():
    """Per-TensorCore VMEM capacity; conservative (v7x, 64 MiB) fallback if the query fails."""
    try:
        cap = getattr(pltpu.get_tpu_info(), "vmem_capacity_bytes", None)
        if cap:
            return int(cap)
    except Exception:
        pass
    return 64 * 1024 * 1024


def _channel_scale(y, w_ref, ypad_ref, k, pad):
    """sigmoid(Conv1d_k over the channel axis)(y) for y of shape (B, C, 1), f32.

    Exact k-tap cross-correlation with zero padding, unrolled as k scalar*vector FMAs
    (weights live in SMEM; ypad_ref is a tiny zero-padded VMEM staging buffer).
    """
    c = y.shape[1]
    ypad_ref[...] = jnp.zeros(ypad_ref.shape, ypad_ref.dtype)      # (B, C + 2*pad, 1)
    ypad_ref[:, pl.ds(pad, c), :] = y
    z = jnp.zeros_like(y)
    for j in range(k):                 # k is tiny & static -> fully unrolled on the VPU
        z = z + w_ref[j] * ypad_ref[:, pl.ds(j, c), :]
    return 1.0 / (1.0 + jnp.exp(-z))   # sigmoid (exp goes to the EUP slot)


def eca_forward(x, conv_w, *, k_size=3, force_hw_tile=None):
    """ECA forward. x: (N, C, H, W); conv_w: Conv1d weight of shape (1, 1, k) or (k,)."""
    N, C, H, W = x.shape
    HW = H * W
    w1 = jnp.asarray(conv_w, jnp.float32).reshape(-1)
    k = int(w1.shape[0])
    pad = (k_size - 1) // 2
    if k != 2 * pad + 1:
        raise ValueError("eca_layer is only shape-consistent when k == 2*pad + 1")

    x3 = x.reshape(N, C, HW)              # NCHW -> (N, C, H*W): no transpose, HW lane-dense
    elem = x.dtype.itemsize
    smem_spec = pl.BlockSpec(memory_space=pltpu.MemorySpace.SMEM)

    # ---- Generation-aware VMEM budgets (v5e/v6e: 128 MiB, v7x: 64 MiB per TensorCore). ----
    vmem_cap = _vmem_capacity_bytes()
    vmem_limit = int(vmem_cap * 0.85)     # scoped limit we ask the compiler for
    budget = int(vmem_cap * 0.70)         # what we let our own blocks occupy (headroom)
    ws_per_elem = 4 * elem + 8            # 2x in + 2x out double-buffers + f32 stats temps
    per_sample_elems = C * HW

    if force_hw_tile is None and per_sample_elems * ws_per_elem <= budget:
        # ------------- fused single pass: x read once, written once (2x slab traffic) -------------
        tn = max(1, budget // (per_sample_elems * ws_per_elem))   # batch samples per grid step
        if N >= 2:
            tn = min(tn, max(1, N // 2))   # keep >= 2 parallel grid steps (v7x has 2 TCs)
        tn = min(tn, N)
        while N % tn:                      # full blocks only
            tn -= 1

        def fused_kernel(x_ref, w_ref, o_ref, ypad_ref):
            xv = x_ref[...]                                        # (tn, C, HW) native dtype
            xs = xv.astype(jnp.float32)
            inv = 1.0 / HW
            mean = jnp.sum(xs, axis=2, keepdims=True) * inv        # (tn, C, 1)
            d = xs - mean
            var = jnp.sum(d * d, axis=2, keepdims=True) * inv      # two-pass: no cancellation
            y = mean + jnp.sqrt(var)                               # avg_pool(x) + stdv_channels(x)
            scale = _channel_scale(y, w_ref, ypad_ref, k, pad)     # (tn, C, 1) f32
            # Multiply in the input's native dtype: no second slab-sized f32 temp, half the
            # store width for bf16 inputs.
            o_ref[...] = (xv * scale.astype(xv.dtype)).astype(o_ref.dtype)

        out3 = pl.pallas_call(
            fused_kernel,
            out_shape=jax.ShapeDtypeStruct((N, C, HW), x.dtype),
            grid=(N // tn,),
            in_specs=[pl.BlockSpec((tn, C, HW), lambda n: (n, 0, 0)), smem_spec],
            out_specs=pl.BlockSpec((tn, C, HW), lambda n: (n, 0, 0)),
            scratch_shapes=[pltpu.VMEM((tn, C + 2 * pad, 1), jnp.float32)],
            compiler_params=pltpu.CompilerParams(
                dimension_semantics=("parallel",),
                vmem_limit_bytes=vmem_limit),
        )(x3, w1)
        return out3.reshape(N, C, H, W)

    # ------------- large spatial sizes: two passes (stats reduction, then apply) -------------
    if force_hw_tile is not None:
        tile_hw = int(force_hw_tile)
    else:
        ws_per_col = max(C * ws_per_elem, 1)                       # working-set bytes per HW column
        tile_hw = max(128, (budget // ws_per_col) // 128 * 128)
    tile_hw = min(tile_hw, HW)
    num_tiles = pl.cdiv(HW, tile_hw)

    def stats_kernel(x_ref, w_ref, s_ref, shift_ref, sum_ref, ssq_ref, ypad_ref):
        t = pl.program_id(1)
        xs = x_ref[...].astype(jnp.float32)                        # (1, C, tile_hw)

        @pl.when(t == 0)
        def _init():
            shift_ref[...] = xs[:, :, 0:1]   # per-channel shift -> cancellation-safe one-pass var
            sum_ref[...] = jnp.zeros(sum_ref.shape, sum_ref.dtype)
            ssq_ref[...] = jnp.zeros(ssq_ref.shape, ssq_ref.dtype)

        d = xs - shift_ref[...]
        if HW % tile_hw != 0:                                      # mask the ragged last tile
            col = jax.lax.broadcasted_iota(jnp.int32, d.shape, 2) + t * tile_hw
            d = jnp.where(col < HW, d, 0.0)
        sum_ref[...] += jnp.sum(d, axis=2, keepdims=True)
        ssq_ref[...] += jnp.sum(d * d, axis=2, keepdims=True)

        @pl.when(t == pl.num_programs(1) - 1)
        def _finalize():
            inv = 1.0 / HW
            md = sum_ref[...] * inv
            mean = shift_ref[...] + md
            var = jnp.maximum(ssq_ref[...] * inv - md * md, 0.0)
            y = mean + jnp.sqrt(var)
            s_ref[...] = _channel_scale(y, w_ref, ypad_ref, k, pad)

    scale = pl.pallas_call(
        stats_kernel,
        out_shape=jax.ShapeDtypeStruct((N, C, 1), jnp.float32),
        grid=(N, num_tiles),
        in_specs=[pl.BlockSpec((1, C, tile_hw), lambda n, t: (n, 0, t)), smem_spec],
        out_specs=pl.BlockSpec((1, C, 1), lambda n, t: (n, 0, 0)),
        scratch_shapes=[pltpu.VMEM((1, C, 1), jnp.float32),
                        pltpu.VMEM((1, C, 1), jnp.float32),
                        pltpu.VMEM((1, C, 1), jnp.float32),
                        pltpu.VMEM((1, C + 2 * pad, 1), jnp.float32)],
        compiler_params=pltpu.CompilerParams(
            dimension_semantics=("parallel", "arbitrary"),
            vmem_limit_bytes=vmem_limit),
    )(x3, w1)

    def apply_kernel(x_ref, s_ref, o_ref):
        # Native-dtype multiply (scale is tiny, cast once); lane-dense tile_hw stores.
        o_ref[...] = (x_ref[...] * s_ref[...].astype(x_ref.dtype)).astype(o_ref.dtype)

    out3 = pl.pallas_call(
        apply_kernel,
        out_shape=jax.ShapeDtypeStruct((N, C, HW), x.dtype),
        grid=(N, num_tiles),
        in_specs=[pl.BlockSpec((1, C, tile_hw), lambda n, t: (n, 0, t)),
                  pl.BlockSpec((1, C, 1), lambda n, t: (n, 0, 0))],
        out_specs=pl.BlockSpec((1, C, tile_hw), lambda n, t: (n, 0, t)),
        compiler_params=pltpu.CompilerParams(
            dimension_semantics=("parallel", "parallel"),
            vmem_limit_bytes=vmem_limit),
    )(x3, scale)
    return out3.reshape(N, C, H, W)


def eca_reference(x, conv_w, *, k_size=3):
    """Pure-JAX mirror of the PyTorch eca_layer forward (for verification)."""
    N, C, H, W = x.shape
    w = jnp.asarray(conv_w, jnp.float32).reshape(-1)
    k = int(w.shape[0])
    pad = (k_size - 1) // 2
    xf = x.astype(jnp.float32)
    mean = jnp.mean(xf, axis=(2, 3))                                      # AdaptiveAvgPool2d(1)
    var = jnp.mean((xf - mean[:, :, None, None]) ** 2, axis=(2, 3))
    y = mean + jnp.sqrt(var)                                              # + stdv_channels(x)
    yp = jnp.pad(y, ((0, 0), (pad, pad)))
    z = jnp.zeros_like(y)
    for j in range(k):                                                    # Conv1d(1, 1, k) over C
        z = z + w[j] * yp[:, j:j + C]
    s = jax.nn.sigmoid(z)
    return (xf * s[:, :, None, None]).astype(x.dtype)


if __name__ == "__main__":
    key = jax.random.PRNGKey(0)
    kx, kw = jax.random.split(key)

    # Module defaults: channel=48, k_size=3, gamma=2, b=1.  (channel=4 would make the PyTorch
    # module itself shape-inconsistent: adaptive k=1 with padding 1 breaks expand_as.)
    N, C, H, W = 2, 48, 16, 16
    gamma, b, k_size = 2, 1, 3
    t = int(abs((math.log(C, 2) + b) / gamma))
    k = t if t % 2 else t + 1                                             # = 3 for C = 48

    x = jax.random.normal(kx, (N, C, H, W), dtype=jnp.float32)
    conv_w = 0.5 * jax.random.normal(kw, (1, 1, k), dtype=jnp.float32)    # Conv1d(1,1,k,bias=False)

    ref = eca_reference(x, conv_w, k_size=k_size)

    # Fused single-pass path (TN-sample batched (TN, C, H*W) slab per grid step).
    out = jax.block_until_ready(eca_forward(x, conv_w, k_size=k_size))
    assert out.shape == x.shape and out.dtype == x.dtype
    assert jnp.allclose(out, ref, atol=5e-4, rtol=5e-4), "fused kernel mismatch vs reference"

    # Tiled two-pass path (grid over (N, hw tiles) with shifted sum/sumsq reduction scratch).
    out_tiled = jax.block_until_ready(
        eca_forward(x, conv_w, k_size=k_size, force_hw_tile=128))
    assert jnp.allclose(out_tiled, ref, atol=5e-4, rtol=5e-4), "tiled kernels mismatch vs reference"

    print("KERNEL_OK")
</pallas_src>

<mosaic_0001>
module attributes {stable_mosaic.version = 11 : i64} {
  func.func @fused_kernel(%arg0: i32, %arg1: memref<1x48x256xf32, #tpu.memory_space<vmem>>, %arg2: memref<3xf32, #tpu.memory_space<smem>>, %arg3: memref<1x48x256xf32, #tpu.memory_space<vmem>>, %arg4: memref<1x50x1xf32, #tpu.memory_space<vmem>>) attributes {dimension_semantics = [#tpu.dimension_semantics<parallel>], iteration_bounds = array<i64: 2>, scalar_prefetch = 0 : i64, scratch_operands = 1 : i64, tpu.core_type = #tpu.core_type<tc>, window_params = [{transform_indices = @transform_0, window_bounds = array<i64: 1, 48, 256>}, {transform_indices = @transform_1, window_bounds = array<i64: 3>}, {transform_indices = @transform_2, window_bounds = array<i64: 1, 48, 256>}]} {
    %c0 = arith.constant 0 : index
    %c0_0 = arith.constant 0 : index
    %c0_1 = arith.constant 0 : index
    %0 = vector.load %arg1[%c0, %c0_0, %c0_1] : memref<1x48x256xf32, #tpu.memory_space<vmem>>, vector<1x48x256xf32>
    %cst = arith.constant dense<0.000000e+00> : vector<1x48xf32>
    %1 = vector.multi_reduction <add>, %0, %cst [2] : vector<1x48x256xf32> to vector<1x48xf32>
    %2 = vector.shape_cast %1 : vector<1x48xf32> to vector<1x48x1xf32>
    %cst_2 = arith.constant 3.906250e-03 : f32
    %3 = vector.broadcast %cst_2 : f32 to vector<1x48x1xf32>
    %4 = arith.mulf %2, %3 : vector<1x48x1xf32>
    %5 = vector.broadcast %4 : vector<1x48x1xf32> to vector<1x48x256xf32>
    %6 = arith.subf %0, %5 : vector<1x48x256xf32>
    %7 = arith.mulf %6, %6 : vector<1x48x256xf32>
    %cst_3 = arith.constant dense<0.000000e+00> : vector<1x48xf32>
    %8 = vector.multi_reduction <add>, %7, %cst_3 [2] : vector<1x48x256xf32> to vector<1x48xf32>
    %9 = vector.shape_cast %8 : vector<1x48xf32> to vector<1x48x1xf32>
    %cst_4 = arith.constant 3.906250e-03 : f32
    %10 = vector.broadcast %cst_4 : f32 to vector<1x48x1xf32>
    %11 = arith.mulf %9, %10 : vector<1x48x1xf32>
    %12 = math.sqrt %11 : vector<1x48x1xf32>
    %13 = arith.addf %4, %12 : vector<1x48x1xf32>
    %cst_5 = arith.constant 0.000000e+00 : f32
    %14 = vector.broadcast %cst_5 : f32 to vector<1x50x1xf32>
    %c0_6 = arith.constant 0 : index
    %c0_7 = arith.constant 0 : index
    %c0_8 = arith.constant 0 : index
    %15 = vector.load %arg4[%c0_6, %c0_7, %c0_8] : memref<1x50x1xf32, #tpu.memory_space<vmem>>, vector<1x50x1xf32>
    tpu.vector_store %arg4[%c0_6, %c0_7, %c0_8], %14 {strides = array<i32>} : memref<1x50x1xf32, #tpu.memory_space<vmem>>, vector<1x50x1xf32>,
    %c0_9 = arith.constant 0 : index
    %c1 = arith.constant 1 : index
    %c0_10 = arith.constant 0 : index
    %16 = vector.load %arg4[%c0_9, %c1, %c0_10] : memref<1x50x1xf32, #tpu.memory_space<vmem>>, vector<1x48x1xf32>
    tpu.vector_store %arg4[%c0_9, %c1, %c0_10], %13 {strides = array<i32>} : memref<1x50x1xf32, #tpu.memory_space<vmem>>, vector<1x48x1xf32>,
    %cst_11 = arith.constant 0.000000e+00 : f32
    %17 = vector.broadcast %cst_11 : f32 to vector<1x48x1xf32>
    %c0_12 = arith.constant 0 : index
    %18 = memref.load %arg2[%c0_12] : memref<3xf32, #tpu.memory_space<smem>>
    %c0_13 = arith.constant 0 : index
    %c0_14 = arith.constant 0 : index
    %c0_15 = arith.constant 0 : index
    %19 = vector.load %arg4[%c0_13, %c0_14, %c0_15] : memref<1x50x1xf32, #tpu.memory_space<vmem>>, vector<1x48x1xf32>
    %20 = vector.broadcast %18 : f32 to vector<1x48x1xf32>
    %21 = arith.mulf %20, %19 : vector<1x48x1xf32>
    %22 = arith.addf %17, %21 : vector<1x48x1xf32>
    %c1_16 = arith.constant 1 : index
    %23 = memref.load %arg2[%c1_16] : memref<3xf32, #tpu.memory_space<smem>>
    %c0_17 = arith.constant 0 : index
    %c1_18 = arith.constant 1 : index
    %c0_19 = arith.constant 0 : index
    %24 = vector.load %arg4[%c0_17, %c1_18, %c0_19] : memref<1x50x1xf32, #tpu.memory_space<vmem>>, vector<1x48x1xf32>
    %25 = vector.broadcast %23 : f32 to vector<1x48x1xf32>
    %26 = arith.mulf %25, %24 : vector<1x48x1xf32>
    %27 = arith.addf %22, %26 : vector<1x48x1xf32>
    %c2 = arith.constant 2 : index
    %28 = memref.load %arg2[%c2] : memref<3xf32, #tpu.memory_space<smem>>
    %c0_20 = arith.constant 0 : index
    %c2_21 = arith.constant 2 : index
    %c0_22 = arith.constant 0 : index
    %29 = vector.load %arg4[%c0_20, %c2_21, %c0_22] : memref<1x50x1xf32, #tpu.memory_space<vmem>>, vector<1x48x1xf32>
    %30 = vector.broadcast %28 : f32 to vector<1x48x1xf32>
    %31 = arith.mulf %30, %29 : vector<1x48x1xf32>
    %32 = arith.addf %27, %31 : vector<1x48x1xf32>
    %cst_23 = arith.constant 0.000000e+00 : f32
    %33 = vector.broadcast %cst_23 : f32 to vector<1x48x1xf32>
    %34 = arith.subf %33, %32 : vector<1x48x1xf32>
    %35 = math.exp %34 : vector<1x48x1xf32>
    %cst_24 = arith.constant 1.000000e+00 : f32
    %36 = vector.broadcast %cst_24 : f32 to vector<1x48x1xf32>
    %37 = arith.addf %36, %35 : vector<1x48x1xf32>
    %cst_25 = arith.constant 1.000000e+00 : f32
    %38 = vector.broadcast %cst_25 : f32 to vector<1x48x1xf32>
    %39 = arith.divf %38, %37 : vector<1x48x1xf32>
    %40 = vector.broadcast %39 : vector<1x48x1xf32> to vector<1x48x256xf32>
    %41 = arith.mulf %0, %40 : vector<1x48x256xf32>
    %c0_26 = arith.constant 0 : index
    %c0_27 = arith.constant 0 : index
    %c0_28 = arith.constant 0 : index
    %42 = vector.load %arg3[%c0_26, %c0_27, %c0_28] : memref<1x48x256xf32, #tpu.memory_space<vmem>>, vector<1x48x256xf32>
    tpu.vector_store %arg3[%c0_26, %c0_27, %c0_28], %41 {strides = array<i32>} : memref<1x48x256xf32, #tpu.memory_space<vmem>>, vector<1x48x256xf32>,
    return
  }
  func.func @transform_0(%arg0: i32) -> (i32, i32, i32) {
    %c0_i32 = arith.constant 0 : i32
    %c0_i32_0 = arith.constant 0 : i32
    %c0_i32_1 = arith.constant 0 : i32
    return %arg0, %c0_i32, %c0_i32_0 : i32, i32, i32
  }
  func.func @transform_1(%arg0: i32) -> i32 {
    %c0_i32 = arith.constant 0 : i32
    %c0_i32_0 = arith.constant 0 : i32
    return %c0_i32 : i32
  }
  func.func @transform_2(%arg0: i32) -> (i32, i32, i32) {
    %c0_i32 = arith.constant 0 : i32
    %c0_i32_0 = arith.constant 0 : i32
    %c0_i32_1 = arith.constant 0 : i32
    return %arg0, %c0_i32, %c0_i32_0 : i32, i32, i32
  }
}

</mosaic_0001>

<bundles_post_ra>
// kernel: tpu_custom_call.1
= control target key start
LH: loop header
LB: loop body
LE: loop exit
PB: predicated region body
PF: predicated region fallthrough
CT: control target
= control target key end

     0   :  { %7 = vsyncpa [#allocation4], 0  ;;  %s1266_s0 = inlined_call_operand.hbm [shape: f32[2,48,256], index: 0, kind: input, shape index: {}]   ;;  %s1267_s1 = inlined_call_operand.hbm [shape: f32[3], index: 1, kind: input, shape index: {}]   ;;  %s1268_s2 = inlined_call_operand.hbm [shape: f32[2,48,256], index: 2, kind: output, shape index: {}]  }
   0x1   :  { %9 = vsyncpa [#allocation4 + $0x1], 0 }
   0x2   :  { %10 = vsyncpa [#allocation6], 0 }
   0x3   :  { %11 = vsyncpa [#allocation5], 0 }
   0x4   :  { %13 = vsyncpa [#allocation5 + $0x1], 0  ;;  %s941_s9 = smov 0   ;;  %s943_s10 = smov 0  }
   0x5   :  { %s945_s11 = smov 0   ;;  %s947_s12 = smov 0  }
   0x6 LB: > { %s962_s13 = sadd.s32 4294967295, %s917_s12   ;;  %s684_s14 = sadd.s32 4294967294, %s917_s12   ;;  %s917_s12 = sphi %s947_s12, %s1279_s12   ;;  %s913_s11 = sphi %s945_s11, %s1278_s11   ;;  %s909_s10 = sphi %s943_s10, %s1277_s10   ;;  %s905_s9 = sphi %s941_s9, %s1276_s9  }
   0x7   : > { %s966_s15 = sadd.s32 1, %s917_s12   ;;  %s26_s16 = sadd.s32 1, %s913_s11 }
   0x8   : > { %s23_s17 = ssub.s32 %s917_s12, %s966_s15  ;;  %p33_p0 = scmp.ne.s32.totalorder %s913_s11, %s909_s10 }
   0x9   : > { %p24_p1 = scmp.eq.s32.totalorder %s23_s17, 0  ;;  %p34_p2 = scmp.eq.s32.totalorder %s917_s12, 0 }
   0xa   : > { %p39_p3 = scmp.ne.s32.totalorder %s909_s10, %s905_s9  ;;  %p40_p4 = scmp.eq.s32.totalorder %s962_s13, 0 }
   0xb   : > { %s978_s18 = scalar_select %p24_p1, %s913_s11, %s26_s16  }
   0xc   : > { %p980_p5 = por %p34_p2, %p33_p0  ;;  %p986_p6 = por %p40_p4, %p39_p3 }
   0xd   : > { %p84_p7 = scmp.eq.s32.totalorder %s962_s13, 1  ;;  %p90_p8 = scmp.eq.s32.totalorder %s684_s14, 1 }
   0xe   : > { %p685_p9 = scmp.ge.s32.totalorder %s917_s12, 1  ;;  %p97_p10 = scmp.lt.s32.totalorder %s917_s12, 3 }
   0xf   : > { %p993_p11 = por %p84_p7, %p33_p0  ;;  %p997_p12 = por %p90_p8, %p39_p3 }
  0x10   : > { %p1001_p13 = pnand %p685_p9, %p97_p10  ;;  %s109_s26 = sshll.u32 %s1267_s1, 4  ;;  %s110_s26 = int_to_ptr.hbm [resolvable:$true] %s109_s26 }
  0x11   : > { %p721_p2 = scmp.lt.s32.totalorder %s917_s12, 2  ;;  %s120_s27 = sand.u32 1, %s913_s11  }
  0x12   : > { %p708_p1 = pneg %p1001_p13  ;;  %s696_s29 = smul.u32 96, %s120_s27 }
  0x13   : > { %p1017_p3 = pnand %p721_p2, %p980_p5  ;;  %s919_s30 = smov [#allocation7]  }
  0x14   : > { %p709_p7 = pnand %p708_p1, %p40_p4  ;;  %s697_s3 = smul.u32 96, %s917_s12 }
  0x15   : > { %s124_s4 = scalar_lea.vmem [#allocation3], %s696_s29  ;;  %s121_s16 = scalar_lea.sflag [#allocation4], %s120_s27 }
  0x16   : > { %711 = dma.hbm_to_smem (!%p709_p7), %s110_s26, 16, %s919_s30, [#allocation6]  }
  0x17   : > { %s132_s5 = sshll.u32 %s124_s4, 4  ;;  %s129_s8 = scalar_lea.hbm %s1266_s0, %s697_s3  ;;  %s133_s5 = int_to_ptr.vmem [resolvable:$true] %s132_s5 }
  0x18   : > { %s130_s14 = sshll.u32 %s129_s8, 4  ;;  %p821_p8 = pneg %p1017_p3  ;;  %s131_s14 = int_to_ptr.hbm [resolvable:$true] %s130_s14 }
  0x19   : > { %s817_s17 = sshra.s32 %s131_s14, 4  ;;  %s824_s26 = scalar_lea.hbm %s1266_s0, 192  ;;  %s818_s17 = int_to_ptr.hbm [resolvable:$true] %s817_s17 }
  0x1a   : > { %s819_s19 = scalar_lea.hbm %s818_s17, 96  ;;  %p825_p1 = scmp.lt.s32.totalorder %s818_s17, %s1266_s0 }
  0x1b   : > { %p820_p5 = scmp.ne.s32.totalorder %s818_s17, %s819_s19  ;;  %p826_p2 = scmp.lt.s32.totalorder %s824_s26, %s819_s19 }
  0x1d   : > { %p822_p9 = pnand %p821_p8, %p820_p5  ;;  %p827_p7 = por %p826_p2, %p825_p1 }
  0x1f   : > { %p823_p10 = pneg %p822_p9 }
  0x21   : > { %p828_p0 = pnand %p827_p7, %p823_p10 }
  0x23   : > { %831 = shalt.err (!%p828_p0)
}
  0x24   : > { %s920_s27 = smov 256   ;;  %s921_s3 = smov 16  }
  0x25   : > { %715 = dma.hbm_to_vmem [thread:$0]  (!%p1017_p3), %s131_s14, 1536, %s133_s5, %s121_s16, %s920_s27, %s920_s27, %s921_s3  }
  0x26   : > { %144 = sbr.rel (%p1001_p13) target bundleno = 503 (0x1f7), region = 28  ;;  %s1038_s4 = sand.u32 (!%p1001_p13), 1, %s909_s10  }
  0x27   : > { %s698_s6 = smul.u32 (!%p1001_p13), 96, %s1038_s4  ;;  %s147_s7 = scalar_lea.sflag (!%p1001_p13), [#allocation4], %s1038_s4 }
  0x29   : > { %s150_s8 = scalar_lea.vmem (!%p1001_p13), [#allocation3], %s698_s6 }
  0x2b   : > { %892 = dma.done.wait (%p986_p6), %s147_s7, 1536  }
  0x2c   : > { %894 = vsyncadd (%p986_p6), %s147_s7, 4294965760 }
  0x2d   : > { %896 = dma.done.wait (%p40_p4), [#allocation6], 16  }
  0x2e   : > { %898 = vsyncadd (%p40_p4), [#allocation6], 4294967280 }
  0x2f   : > { %161 = sfence }
  0x30   : > { %v1052_v0 = vld [vmem:[%s150_s8 + $0x40] sm:$0xff]  ;;  %v1054_v1 = vld [vmem:[%s150_s8 + $0x48] sm:$0xff]  ;;  %v1070_v9 = vld [vmem:[%s150_s8 + $0x50] sm:$0xff]  ;;  %vm340_vm0 = vcmask 7168   ;;  %v922_v18 = vmov 0.0   ;;  %vm347_vm1 = vcmask 1024  }
  0x31   : > { %v1056_v2 = vld [vmem:[%s150_s8 + $0x20] sm:$0xff]  ;;  %v202_v3 = vadd.f32 %v1054_v1, %v1052_v0  ;;  %v1060_v4 = vld [vmem:[%s150_s8 + $0x28] sm:$0xff]  ;;  %v1072_v10 = vld [vmem:[%s150_s8 + $0x58] sm:$0xff]  ;;  %343 = vst.msk [vmem:[#allocation2 + $0x10] sm:$0xff] %vm340_vm0, %v922_v18  ;;  %s1151_s20 = sld [smem:[#allocation7]]  ;;  %s1208_s5 = scalar_lea.vmem [#allocation8], %s698_s6 }
  0x32   : > { %v1062_v5 = vld [vmem:[%s150_s8] sm:$0xff]  ;;  %v1064_v6 = vld [vmem:[%s150_s8 + $0x8] sm:$0xff]  ;;  %v196_v7 = vadd.f32 %v1060_v4, %v1056_v2  ;;  %v1074_v11 = vld [vmem:[%s150_s8 + $0x30] sm:$0xff]  ;;  %v205_v15 = vadd.f32 %v1072_v10, %v1070_v9  ;;  %344 = vst.msk [vmem:[#allocation2 + $0x18] sm:$0xff] %vm340_vm0, %v922_v18  ;;  %s691_s23 = sld [smem:[#allocation7 + $0x1]]  ;;  %s699_s14 = smul.u32 96, %s962_s13 }
  0x33   : > { %v190_v8 = vadd.f32 %v1064_v6, %v1062_v5  ;;  %203 = vadd.xlane.f32.xlu2 %v202_v3  ;;  %v1076_v12 = vld [vmem:[%s150_s8 + $0x38] sm:$0xff]  ;;  %v1078_v13 = vld [vmem:[%s150_s8 + $0x10] sm:$0xff]  ;;  %341 = vst.msk [vmem:[#allocation2] sm:$0xff] %vm340_vm0, %v922_v18  ;;  %s692_s28 = sld [smem:[#allocation7 + $0x2]]  ;;  %s596_s24 = sshll.u32 %s1208_s5, 4  ;;  %s597_s24 = int_to_ptr.vmem [resolvable:$true] %s596_s24 }
  0x34   : > { %197 = vadd.xlane.f32.xlu1 %v196_v7  ;;  %v1080_v14 = vld [vmem:[%s150_s8 + $0x18] sm:$0xff]  ;;  %v199_v16 = vadd.f32 %v1076_v12, %v1074_v11  ;;  %342 = vst.msk [vmem:[#allocation2 + $0x8] sm:$0xff] %vm340_vm0, %v922_v18  ;;  %s595_s19 = scalar_lea.hbm %s1268_s2, %s699_s14  ;;  %s584_s13 = scalar_lea.sflag [#allocation5], %s1038_s4 }
  0x35   : > { %191 = vadd.xlane.f32.xlu0 %v190_v8  ;;  %v193_v17 = vadd.f32 %v1080_v14, %v1078_v13  ;;  %345 = vst.msk [vmem:[#allocation2 + $0x20] sm:$0xff] %vm340_vm0, %v922_v18  ;;  %s598_s25 = sshll.u32 %s595_s19, 4  ;;  %s867_s3 = scalar_lea.hbm %s1268_s2, 192  ;;  %s599_s25 = int_to_ptr.hbm [resolvable:$true] %s598_s25 }
  0x36   : > { %346 = vst.msk [vmem:[#allocation2 + $0x28] sm:$0xff] %vm340_vm0, %v922_v18  ;;  %s861_s26 = sshra.s32 %s599_s25, 4  ;;  %s862_s26 = int_to_ptr.hbm [resolvable:$true] %s861_s26 }
  0x37   : > { %348 = vst.msk [vmem:[#allocation2 + $0x30] sm:$0x3] %vm347_vm1, %v922_v18  ;;  %s863_s29 = scalar_lea.hbm %s862_s26, 96  ;;  %p868_p0 = scmp.lt.s32.totalorder %s862_s26, %s1268_s2 }
  0x38   : > { %p864_p4 = scmp.ne.s32.totalorder %s862_s26, %s863_s29  ;;  %p869_p3 = scmp.lt.s32.totalorder %s867_s3, %s863_s29 }
  0x3a   : > { %p865_p6 = pnand %p864_p4, %p993_p11  ;;  %p870_p5 = por %p869_p3, %p868_p0 }
  0x3b   : > { %206 = vadd.xlane.f32.xlu2 %v205_v15 }
  0x3c   : > { %200 = vadd.xlane.f32.xlu1 %v199_v16  ;;  %p866_p13 = pneg %p865_p6 }
  0x3d   : > { %194 = vadd.xlane.f32.xlu0 %v193_v17 }
  0x3e   : > { %p871_p8 = pnand %p870_p5, %p866_p13 }
  0xa6   : > { %v204_v19 = vpop.xlane.xlu2 %203 }
  0xa7   : > { %v198_v20 = vpop.xlane.xlu1 %197  ;;  %v1124_v46 = vmul.f32 0.00390625, %v204_v19 }
  0xa8   : > { %v192_v21 = vpop.xlane.xlu0 %191  ;;  %v1094_v22 = vmul.f32 0.00390625, %v198_v20 }
  0xa9   : > { %v1096_v23 = vmul.f32 0.00390625, %v192_v21  ;;  %v222_v56 = vsub.f32 %v1052_v0, %v1124_v46  ;;  %v223_v57 = vsub.f32 %v1054_v1, %v1124_v46 }
  0xaa   : > { %v218_v24 = vsub.f32 %v1056_v2, %v1094_v22  ;;  %v219_v25 = vsub.f32 %v1060_v4, %v1094_v22 }
  0xab   : > { %v214_v26 = vsub.f32 %v1062_v5, %v1096_v23  ;;  %v215_v27 = vsub.f32 %v1064_v6, %v1096_v23  ;;  %v234_v58 = vmul.f32 %v222_v56, %v222_v56  ;;  %v235_v59 = vmul.f32 %v223_v57, %v223_v57 }
  0xac   : > { %v230_v28 = vmul.f32 %v218_v24, %v218_v24  ;;  %v231_v29 = vmul.f32 %v219_v25, %v219_v25 }
  0xad   : > { %v226_v30 = vmul.f32 %v214_v26, %v214_v26  ;;  %v227_v31 = vmul.f32 %v215_v27, %v215_v27  ;;  %v250_v60 = vadd.f32 %v235_v59, %v234_v58 }
  0xae   : > { %v207_v32 = vpop.xlane.xlu2 %206  ;;  %v244_v33 = vadd.f32 %v231_v29, %v230_v28 }
  0xaf   : > { %v238_v34 = vadd.f32 %v227_v31, %v226_v30  ;;  %v1106_v35 = vmul.f32 0.00390625, %v207_v32  ;;  %v201_v36 = vpop.xlane.xlu1 %200  ;;  %v923_v30 = vmov 0  }
  0xb0   : > { %v195_v37 = vpop.xlane.xlu0 %194  ;;  %v1108_v38 = vmul.f32 0.00390625, %v201_v36  ;;  %245 = vadd.xlane.f32.xlu2 %v244_v33  ;;  %763 = vset.pattern.permute.xlu0 %v923_v30 }
  0xb1   : > { %v1110_v39 = vmul.f32 0.00390625, %v195_v37  ;;  %239 = vadd.xlane.f32.xlu0 %v238_v34  ;;  %v224_v40 = vsub.f32 %v1070_v9, %v1106_v35  ;;  %v225_v41 = vsub.f32 %v1072_v10, %v1106_v35  ;;  %765 = vset.pattern.permute.xlu2 %v923_v30 }
  0xb2   : > { %v220_v42 = vsub.f32 %v1074_v11, %v1108_v38  ;;  %v221_v43 = vsub.f32 %v1076_v12, %v1108_v38  ;;  %764 = vset.pattern.permute.xlu1 %v923_v30 }
  0xb3   : > { %v216_v44 = vsub.f32 %v1078_v13, %v1110_v39  ;;  %v217_v45 = vsub.f32 %v1080_v14, %v1110_v39  ;;  %v236_v47 = vmul.f32 %v224_v40, %v224_v40  ;;  %v237_v48 = vmul.f32 %v225_v41, %v225_v41 }
  0xb4   : > { %v232_v49 = vmul.f32 %v220_v42, %v220_v42  ;;  %v233_v50 = vmul.f32 %v221_v43, %v221_v43 }
  0xb5   : > { %v228_v51 = vmul.f32 %v216_v44, %v216_v44  ;;  %v229_v52 = vmul.f32 %v217_v45, %v217_v45  ;;  %v253_v53 = vadd.f32 %v237_v48, %v236_v47 }
  0xb6   : > { %v247_v54 = vadd.f32 %v233_v50, %v232_v49 }
  0xb7   : > { %v241_v55 = vadd.f32 %v229_v52, %v228_v51 }
  0xb8   : > { %254 = vadd.xlane.f32.xlu2 %v253_v53 }
  0xb9   : > { %248 = vadd.xlane.f32.xlu0 %v247_v54  ;;  %242 = vadd.xlane.f32.xlu1 %v241_v55 }
  0xc1   : > { %251 = vadd.xlane.f32.xlu1 %v250_v60 }
 0x123   : > { %v246_v61 = vpop.xlane.xlu2 %245 }
 0x124   : > { %v240_v62 = vpop.xlane.xlu0 %239  ;;  %v258_v63 = vmul.f32 0.00390625, %v246_v61 }
 0x125   : > { %v256_v3 = vmul.f32 0.00390625, %v240_v62 }
 0x126   : > { %766 = vrsqrt.f32 %v258_v63  ;;  %vm293_vm2 = vcmp.eq.f32.partialorder %v258_v63, inf  ;;  %vm295_vm3 = vcmp.eq.f32.partialorder %v258_v63, 0.0  ;;  %v296_v48 = vand.u32 2147483648, %v258_v63 }
 0x127   : > { %768 = vrsqrt.f32 %v256_v3  ;;  %vm269_vm4 = vcmp.eq.f32.partialorder %v256_v3, inf  ;;  %v272_v52 = vand.u32 2147483648, %v256_v3  ;;  %vm271_vm5 = vcmp.eq.f32.partialorder %v256_v3, 0.0 }
 0x12b   : > { %v255_v7 = vpop.xlane.xlu2 %254 }
 0x12c   : > { %v249_v8 = vpop.xlane.xlu0 %248  ;;  %v767_v15 = vpop.eup %766  ;;  %v1130_v16 = vmul.f32 0.00390625, %v255_v7 }
 0x12d   : > { %v243_v17 = vpop.xlane.xlu1 %242  ;;  %v1132_v19 = vmul.f32 0.00390625, %v249_v8  ;;  %v769_v20 = vpop.eup %768  ;;  %v287_v21 = vmul.f32 %v767_v15, %v258_v63 }
 0x12e   : > { %v1134_v24 = vmul.f32 0.00390625, %v243_v17  ;;  %v263_v25 = vmul.f32 %v769_v20, %v256_v3  ;;  %770 = vrsqrt.f32 %v1130_v16  ;;  %vm329_vm6 = vcmp.eq.f32.partialorder %v1130_v16, inf }
 0x12f   : > { %v288_v18 = vmul.f32 %v767_v15, %v287_v21  ;;  %vm331_vm7 = vcmp.eq.f32.partialorder %v1130_v16, 0.0  ;;  %vm305_vm10 = vcmp.eq.f32.partialorder %v1132_v19, inf  ;;  %v308_v30 = vand.u32 2147483648, %v1132_v19 }
 0x130   : > { %772 = vrsqrt.f32 %v1134_v24  ;;  %v264_v26 = vmul.f32 %v769_v20, %v263_v25  ;;  %vm281_vm8 = vcmp.eq.f32.partialorder %v1134_v24, inf  ;;  %vm283_vm9 = vcmp.eq.f32.partialorder %v1134_v24, 0.0 }
 0x131   : > { %774 = vrsqrt.f32 %v1132_v19  ;;  %v289_v27 = vmul.f32 0.5, %v288_v18  ;;  %vm307_vm11 = vcmp.eq.f32.partialorder %v1132_v19, 0.0 }
 0x132   : > { %v265_v28 = vmul.f32 0.5, %v264_v26  ;;  %v284_v26 = vand.u32 2147483648, %v1134_v24 }
 0x133   : > { %v290_v29 = vsub.f32 1.5, %v289_v27 }
 0x134   : > { %v771_v31 = vpop.eup %770  ;;  %v266_v32 = vsub.f32 1.5, %v265_v28 }
 0x135   : > { %v252_v33 = vpop.xlane.xlu1 %251  ;;  %v291_v36 = vmul.f32 %v767_v15, %v290_v29  ;;  %v323_v37 = vmul.f32 %v771_v31, %v1130_v16 }
 0x136   : > { %v773_v34 = vpop.eup %772  ;;  %v1140_v40 = vmul.f32 0.00390625, %v252_v33  ;;  %v267_v42 = vmul.f32 %v769_v20, %v266_v32 }
 0x137   : > { %v775_v41 = vpop.eup %774  ;;  %v275_v43 = vmul.f32 %v773_v34, %v1134_v24  ;;  %v292_v44 = vmul.f32 %v291_v36, %v258_v63  ;;  %v324_v45 = vmul.f32 %v771_v31, %v323_v37 }
 0x138   : > { %v299_v47 = vmul.f32 %v775_v41, %v1132_v19  ;;  %776 = vrsqrt.f32 %v1140_v40  ;;  %v268_v49 = vmul.f32 %v267_v42, %v256_v3  ;;  %v362_v42 = vstv %s1151_s20 }
 0x139   : > { %v276_v50 = vmul.f32 %v773_v34, %v275_v43  ;;  %v294_v51 = vsel %vm293_vm2, %v258_v63, %v292_v44  ;;  %v325_v53 = vmul.f32 0.5, %v324_v45  ;;  %v382_v44 = vstv %s691_s23 }
 0x13a   : > { %v300_v54 = vmul.f32 %v775_v41, %v299_v47  ;;  %v297_v55 = vsel %vm295_vm3, %v296_v48, %v294_v51  ;;  %v270_v56 = vsel %vm269_vm4, %v256_v3, %v268_v49  ;;  %vm317_vm12 = vcmp.eq.f32.partialorder %v1140_v40, inf }
 0x13b   : > { %v277_v57 = vmul.f32 0.5, %v276_v50  ;;  %v336_v58 = vadd.f32 %v297_v55, %v1094_v22  ;;  %v273_v59 = vsel %vm271_vm5, %v272_v52, %v270_v56  ;;  %v326_v60 = vsub.f32 1.5, %v325_v53 }
 0x13c   : > { %v301_v61 = vmul.f32 0.5, %v300_v54  ;;  %v334_v62 = vadd.f32 %v273_v59, %v1096_v23  ;;  %v332_v23 = vand.u32 2147483648, %v1130_v16  ;;  %vm319_vm13 = vcmp.eq.f32.partialorder %v1140_v40, 0.0 }
 0x13d   : > { %v278_v7 = vsub.f32 1.5, %v277_v57  ;;  %351 = vst.msk [vmem:[#allocation2 + $0x11] sm:$0xff] %vm340_vm0, %v336_v58  ;;  %v327_v15 = vmul.f32 %v771_v31, %v326_v60  ;;  %v402_v49 = vstv %s692_s28 }
 0x13e   : > { %v777_v8 = vpop.eup %776  ;;  %v302_v63 = vsub.f32 1.5, %v301_v61  ;;  %349 = vst.msk [vmem:[#allocation2 + $0x1] sm:$0xff] %vm340_vm0, %v334_v62 }
 0x13f   : > { %v279_v17 = vmul.f32 %v773_v34, %v278_v7  ;;  %v311_v3 = vmul.f32 %v777_v8, %v1140_v40  ;;  %v328_v22 = vmul.f32 %v327_v15, %v1130_v16 }
 0x140   : > { %v303_v20 = vmul.f32 %v775_v41, %v302_v63 }
 0x141   : > { %v280_v21 = vmul.f32 %v279_v17, %v1134_v24  ;;  %v312_v25 = vmul.f32 %v777_v8, %v311_v3  ;;  %v330_v18 = vsel %vm329_vm6, %v1130_v16, %v328_v22 }
 0x142   : > { %v304_v27 = vmul.f32 %v303_v20, %v1132_v19  ;;  %v333_v28 = vsel %vm331_vm7, %v332_v23, %v330_v18 }
 0x143   : > { %v282_v29 = vsel %vm281_vm8, %v1134_v24, %v280_v21  ;;  %v313_v31 = vmul.f32 0.5, %v312_v25  ;;  %v339_v32 = vadd.f32 %v333_v28, %v1106_v35 }
 0x144   : > { %v285_v33 = vsel %vm283_vm9, %v284_v26, %v282_v29  ;;  %v306_v34 = vsel %vm305_vm10, %v1132_v19, %v304_v27  ;;  %v378_v51 = vld [vmem:[#allocation2 + $0x11] sm:$0xff] }
 0x145   : > { %v335_v16 = vadd.f32 %v285_v33, %v1110_v39  ;;  %v309_v36 = vsel %vm307_vm11, %v308_v30, %v306_v34  ;;  %v314_v37 = vsub.f32 1.5, %v313_v31  ;;  %354 = vst.msk [vmem:[#allocation2 + $0x29] sm:$0xff] %vm340_vm0, %v339_v32  ;;  %v356_v35 = vld [vmem:[#allocation2] sm:$0xff]  ;;  %v320_v39 = vand.u32 2147483648, %v1140_v40 }
 0x146   : > { %v337_v24 = vadd.f32 %v309_v36, %v1108_v38  ;;  %v376_v43 = vld [vmem:[#allocation2 + $0x1] sm:$0xff]  ;;  %v363_v38 = vmul.f32 %v362_v42, %v356_v35  ;;  %v385_v62 = vmul.f32 %v382_v44, %v378_v51 }
 0x147   : > { %350 = vst.msk [vmem:[#allocation2 + $0x9] sm:$0xff] %vm340_vm0, %v335_v16  ;;  %v315_v41 = vmul.f32 %v777_v8, %v314_v37  ;;  %v383_v47 = vmul.f32 %v382_v44, %v376_v43 }
 0x148   : > { %352 = vst.msk [vmem:[#allocation2 + $0x19] sm:$0xff] %vm340_vm0, %v337_v24 }
 0x149   : > { %v316_v19 = vmul.f32 %v315_v41, %v1140_v40  ;;  %v389_v55 = vadd.f32 %v383_v47, %v363_v38 }
 0x14b   : > { %v318_v45 = vsel %vm317_vm12, %v1140_v40, %v316_v19 }
 0x14c   : > { %v321_v48 = vsel %vm319_vm13, %v320_v39, %v318_v45  ;;  %v381_v20 = vld [vmem:[#allocation2 + $0x29] sm:$0xff] }
 0x14d   : > { %v338_v50 = vadd.f32 %v321_v48, %v1124_v46  ;;  %v388_v32 = vmul.f32 %v382_v44, %v381_v20  ;;  %v401_v24 = vld [vmem:[#allocation2 + $0x2a] sm:$0xff] }
 0x14e   : > { %v396_v52 = vld [vmem:[#allocation2 + $0x2] sm:$0xff]  ;;  %v397_v59 = vld [vmem:[#allocation2 + $0xa] sm:$0xff]  ;;  %v408_v48 = vmul.f32 %v402_v49, %v401_v24 }
 0x14f   : > { %v357_v53 = vld [vmem:[#allocation2 + $0x8] sm:$0xff]  ;;  %353 = vst.msk [vmem:[#allocation2 + $0x21] sm:$0xff] %vm340_vm0, %v338_v50  ;;  %v403_v56 = vmul.f32 %v402_v49, %v396_v52  ;;  %v358_v60 = vld [vmem:[#allocation2 + $0x10] sm:$0xff]  ;;  %v404_v15 = vmul.f32 %v402_v49, %v397_v59  ;;  %v359_v63 = vld [vmem:[#allocation2 + $0x18] sm:$0xff] }
 0x150   : > { %v377_v54 = vld [vmem:[#allocation2 + $0x9] sm:$0xff]  ;;  %v364_v57 = vmul.f32 %v362_v42, %v357_v53  ;;  %v398_v61 = vld [vmem:[#allocation2 + $0x12] sm:$0xff]  ;;  %v365_v40 = vmul.f32 %v362_v42, %v358_v60  ;;  %v366_v25 = vmul.f32 %v362_v42, %v359_v63 }
 0x151   : > { %v384_v58 = vmul.f32 %v382_v44, %v377_v54  ;;  %v409_v7 = vadd.f32 %v403_v56, %v389_v55  ;;  %v379_v46 = vld [vmem:[#allocation2 + $0x19] sm:$0xff]  ;;  %v405_v3 = vmul.f32 %v402_v49, %v398_v61 }
 0x152   : > { %v391_v17 = vadd.f32 %v385_v62, %v365_v40  ;;  %v386_v18 = vmul.f32 %v382_v44, %v379_v46 }
 0x153   : > { %v390_v8 = vadd.f32 %v384_v58, %v364_v57  ;;  %v415_v22 = vsub.f32 0.0, %v409_v7 }
 0x154   : > { %v411_v21 = vadd.f32 %v405_v3, %v391_v17  ;;  %v392_v35 = vadd.f32 %v386_v18, %v366_v25 }
 0x155   : > { %v410_v23 = vadd.f32 %v404_v15, %v390_v8  ;;  %v421_v26 = vmul.f32 1.442695, %v415_v22 }
 0x156   : > { %v417_v28 = vsub.f32 0.0, %v411_v21  ;;  %v360_v29 = vld [vmem:[#allocation2 + $0x20] sm:$0xff]  ;;  %v361_v37 = vld [vmem:[#allocation2 + $0x28] sm:$0xff] }
 0x157   : > { %v416_v27 = vsub.f32 0.0, %v410_v23  ;;  %v380_v30 = vld [vmem:[#allocation2 + $0x21] sm:$0xff]  ;;  %778 = vpow2.f32 %v421_v26  ;;  %v367_v34 = vmul.f32 %v362_v42, %v360_v29  ;;  %v368_v19 = vmul.f32 %v362_v42, %v361_v37 }
 0x158   : > { %v400_v31 = vld [vmem:[#allocation2 + $0x22] sm:$0xff]  ;;  %v387_v16 = vmul.f32 %v382_v44, %v380_v30  ;;  %v399_v36 = vld [vmem:[#allocation2 + $0x1a] sm:$0xff]  ;;  %v425_v41 = vmul.f32 1.442695, %v417_v28 }
 0x159   : > { %v423_v33 = vmul.f32 1.442695, %v416_v27  ;;  %v406_v43 = vmul.f32 %v402_v49, %v399_v36  ;;  %v407_v45 = vmul.f32 %v402_v49, %v400_v31  ;;  %v394_v47 = vadd.f32 %v388_v32, %v368_v19 }
 0x15a   : > { %v393_v39 = vadd.f32 %v387_v16, %v367_v34 }
 0x15b   : > { %780 = vpow2.f32 %v423_v33  ;;  %v412_v38 = vadd.f32 %v406_v43, %v392_v35  ;;  %v414_v52 = vadd.f32 %v408_v48, %v394_v47 }
 0x15c   : > { %782 = vpow2.f32 %v425_v41  ;;  %v413_v50 = vadd.f32 %v407_v45, %v393_v39 }
 0x15d   : > { %v418_v51 = vsub.f32 0.0, %v412_v38  ;;  %v779_v53 = vpop.eup %778  ;;  %v420_v56 = vsub.f32 0.0, %v414_v52 }
 0x15e   : > { %v419_v54 = vsub.f32 0.0, %v413_v50  ;;  %v433_v44 = vadd.f32 1.0, %v779_v53 }
 0x15f   : > { %v427_v55 = vmul.f32 1.442695, %v418_v51  ;;  %v431_v61 = vmul.f32 1.442695, %v420_v56 }
 0x160   : > { %v429_v58 = vmul.f32 1.442695, %v419_v54  ;;  %784 = vrcp.f32 %v433_v44  ;;  %v450_v8 = vand.u32 2147483648, %v433_v44  ;;  %vm444_vm14 = vweird.f32 %v433_v44 }
 0x161   : > { %v781_v57 = vpop.eup %780  ;;  %v448_v21 = vand.u32 2147483647, %v433_v44 }
 0x162   : > { %v783_v59 = vpop.eup %782  ;;  %v434_v42 = vadd.f32 1.0, %v781_v57  ;;  %786 = vpow2.f32 %v429_v58  ;;  %v451_v18 = vor.u32 1.1754944e-38, %v450_v8 }
 0x163   : > { %v435_v60 = vadd.f32 1.0, %v783_v59  ;;  %788 = vpow2.f32 %v427_v55  ;;  %vm449_vm2 = vcmp.eq.f32.partialorder %v448_v21, 8.507059e+37 }
 0x164   : > { %790 = vrcp.f32 %v434_v42  ;;  %v463_v27 = vand.u32 2147483647, %v434_v42  ;;  %v465_v29 = vand.u32 2147483648, %v434_v42  ;;  %vm459_vm4 = vweird.f32 %v434_v42 }
 0x165   : > { %792 = vrcp.f32 %v435_v60  ;;  %v478_v31 = vand.u32 2147483647, %v435_v60  ;;  %v480_v33 = vand.u32 2147483648, %v435_v60  ;;  %vm474_vm6 = vweird.f32 %v435_v60 }
 0x166   : > { %794 = vpow2.f32 %v431_v61  ;;  %v785_v49 = vpop.eup %784  ;;  %v466_v35 = vor.u32 1.1754944e-38, %v465_v29  ;;  %vm464_vm7 = vcmp.eq.f32.partialorder %v463_v27, 8.507059e+37 }
 0x167   : > { %v440_v62 = vmul.f32 %v785_v49, %v433_v44  ;;  %vm445_vm15 = vweird.f32 %v785_v49  ;;  %vm479_vm9 = vcmp.eq.f32.partialorder %v478_v31, 8.507059e+37  ;;  %v481_v38 = vor.u32 1.1754944e-38, %v480_v33 }
 0x168   : > { %v787_v40 = vpop.eup %786  ;;  %vm446_vm0 = vmor %vm444_vm14, %vm445_vm15 }
 0x169   : > { %v789_v7 = vpop.eup %788  ;;  %v1181_v15 = vadd.f32 1.0, %v787_v40  ;;  %v441_v46 = vsub.f32 1.0, %v440_v62 }
 0x16a   : > { %v791_v63 = vpop.eup %790  ;;  %v1183_v17 = vadd.f32 1.0, %v789_v7 }
 0x16b   : > { %v793_v3 = vpop.eup %792  ;;  %v455_v22 = vmul.f32 %v791_v63, %v434_v42  ;;  %796 = vrcp.f32 %v1181_v15  ;;  %v442_v20 = vmul.f32 %v785_v49, %v441_v46  ;;  %vm460_vm1 = vweird.f32 %v791_v63 }
 0x16c   : > { %v795_v23 = vpop.eup %794  ;;  %v470_v25 = vmul.f32 %v793_v3, %v435_v60  ;;  %798 = vrcp.f32 %v1183_v17  ;;  %vm475_vm3 = vweird.f32 %v793_v3  ;;  %vm461_vm5 = vmor %vm459_vm4, %vm460_vm1  ;;  %v510_v53 = vand.u32 2147483648, %v1181_v15 }
 0x16d   : > { %v456_v26 = vsub.f32 1.0, %v455_v22  ;;  %v443_v28 = vadd.f32 %v785_v49, %v442_v20  ;;  %v1188_v34 = vadd.f32 1.0, %v795_v23  ;;  %vm476_vm8 = vmor %vm474_vm6, %vm475_vm3  ;;  %v508_v44 = vand.u32 2147483647, %v1181_v15 }
 0x16e   : > { %v471_v30 = vsub.f32 1.0, %v470_v25  ;;  %vm504_vm11 = vweird.f32 %v1181_v15  ;;  %v493_v57 = vand.u32 2147483647, %v1183_v17  ;;  %v495_v58 = vand.u32 2147483648, %v1183_v17 }
 0x16f   : > { %v457_v32 = vmul.f32 %v791_v63, %v456_v26  ;;  %v447_v16 = vsel %vm446_vm0, %v785_v49, %v443_v28  ;;  %800 = vrcp.f32 %v1188_v34  ;;  %v511_v61 = vor.u32 1.1754944e-38, %v510_v53 }
 0x170   : > { %v472_v36 = vmul.f32 %v793_v3, %v471_v30  ;;  %v452_v24 = vsel %vm449_vm2, %v451_v18, %v447_v16  ;;  %vm489_vm14 = vweird.f32 %v1183_v17  ;;  %vm509_vm15 = vcmp.eq.f32.partialorder %v508_v44, 8.507059e+37 }
 0x171   : > { %v797_v37 = vpop.eup %796  ;;  %v458_v41 = vadd.f32 %v791_v63, %v457_v32  ;;  %531 = vperm.xlu0 %763, %v452_v24   ;;  %v496_v8 = vor.u32 1.1754944e-38, %v495_v58  ;;  %vm494_vm1 = vcmp.eq.f32.partialorder %v493_v57, 8.507059e+37  ;;  %v525_v22 = vand.u32 2147483648, %v1188_v34 }
 0x172   : > { %v473_v43 = vadd.f32 %v793_v3, %v472_v36  ;;  %v500_v19 = vmul.f32 %v797_v37, %v1181_v15  ;;  %v799_v39 = vpop.eup %798  ;;  %vm505_vm10 = vweird.f32 %v797_v37  ;;  %vm519_vm3 = vweird.f32 %v1188_v34 }
 0x173   : > { %v462_v45 = vsel %vm461_vm5, %v791_v63, %v458_v41  ;;  %v485_v51 = vmul.f32 %v799_v39, %v1183_v17  ;;  %vm490_vm12 = vweird.f32 %v799_v39  ;;  %vm506_vm13 = vmor %vm504_vm11, %vm505_vm10  ;;  %v523_v17 = vand.u32 2147483647, %v1188_v34 }
 0x174   : > { %v467_v47 = vsel %vm464_vm7, %v466_v35, %v462_v45  ;;  %v477_v48 = vsel %vm476_vm8, %v793_v3, %v473_v43  ;;  %v501_v50 = vsub.f32 1.0, %v500_v19  ;;  %vm491_vm0 = vmor %vm489_vm14, %vm490_vm12  ;;  %v526_v20 = vor.u32 1.1754944e-38, %v525_v22 }
 0x175   : > { %536 = vperm.xlu1 %764, %v467_v47   ;;  %v482_v52 = vsel %vm479_vm9, %v481_v38, %v477_v48  ;;  %v486_v55 = vsub.f32 1.0, %v485_v51  ;;  %v801_v56 = vpop.eup %800  ;;  %vm524_vm5 = vcmp.eq.f32.partialorder %v523_v17, 8.507059e+37 }
 0x176   : > { %541 = vperm.xlu2 %765, %v482_v52   ;;  %v502_v54 = vmul.f32 %v797_v37, %v501_v50  ;;  %v515_v60 = vmul.f32 %v801_v56, %v1188_v34  ;;  %vm520_vm2 = vweird.f32 %v801_v56 }
 0x177   : > { %v487_v42 = vmul.f32 %v799_v39, %v486_v55  ;;  %vm521_vm4 = vmor %vm519_vm3, %vm520_vm2 }
 0x178   : > { %v503_v59 = vadd.f32 %v797_v37, %v502_v54  ;;  %v516_v62 = vsub.f32 1.0, %v515_v60 }
 0x179   : > { %v488_v40 = vadd.f32 %v799_v39, %v487_v42 }
 0x17a   : > { %v507_v49 = vsel %vm506_vm13, %v797_v37, %v503_v59  ;;  %v517_v63 = vmul.f32 %v801_v56, %v516_v62 }
 0x17b   : > { %v512_v7 = vsel %vm509_vm15, %v511_v61, %v507_v49  ;;  %v492_v15 = vsel %vm491_vm0, %v799_v39, %v488_v40 }
 0x17c   : > { %v497_v46 = vsel %vm494_vm1, %v496_v8, %v492_v15  ;;  %v518_v3 = vadd.f32 %v801_v56, %v517_v63 }
 0x17d   : > { %551 = vperm.xlu1 %764, %v512_v7  }
 0x17e   : > { %546 = vperm.xlu2 %765, %v497_v46   ;;  %v522_v23 = vsel %vm521_vm4, %v801_v56, %v518_v3 }
 0x17f   : > { %v527_v21 = vsel %vm524_vm5, %v526_v20, %v522_v23 }
 0x186   : > { %556 = vperm.xlu2 %765, %v527_v21  }
 0x1d0   : > { %v542_v25 = vpop.permute.xlu2 %541 }
 0x1d1   : > { %v563_v18 = vmul.f32 %v542_v25, %v1056_v2  ;;  %v564_v26 = vmul.f32 %v542_v25, %v1060_v4 }
 0x1d3   : > { %575 = vst [vmem:[%s1208_s5 + $0x20] sm:$0xff] %v563_v18 }
 0x1d4   : > { %576 = vst [vmem:[%s1208_s5 + $0x28] sm:$0xff] %v564_v26 }
 0x1d8   : > { %v547_v27 = vpop.permute.xlu2 %546 }
 0x1d9   : > { %v565_v28 = vmul.f32 %v547_v27, %v1074_v11  ;;  %v566_v2 = vmul.f32 %v547_v27, %v1076_v12 }
 0x1db   : > { %577 = vst [vmem:[%s1208_s5 + $0x30] sm:$0xff] %v565_v28 }
 0x1dc   : > { %578 = vst [vmem:[%s1208_s5 + $0x38] sm:$0xff] %v566_v2 }
 0x1e0   : > { %v557_v4 = vpop.permute.xlu2 %556 }
 0x1e1   : > { %v569_v29 = vmul.f32 %v557_v4, %v1070_v9  ;;  %v570_v30 = vmul.f32 %v557_v4, %v1072_v10 }
 0x1e3   : > { %581 = vst [vmem:[%s1208_s5 + $0x50] sm:$0xff] %v569_v29  ;;  %v532_v31 = vpop.permute.xlu0 %531 }
 0x1e4   : > { %582 = vst [vmem:[%s1208_s5 + $0x58] sm:$0xff] %v570_v30  ;;  %v559_v32 = vmul.f32 %v532_v31, %v1062_v5  ;;  %v560_v33 = vmul.f32 %v532_v31, %v1064_v6 }
 0x1e6   : > { %571 = vst [vmem:[%s1208_s5] sm:$0xff] %v559_v32 }
 0x1e7   : > { %v537_v11 = vpop.permute.xlu1 %536  ;;  %572 = vst [vmem:[%s1208_s5 + $0x8] sm:$0xff] %v560_v33 }
 0x1e8   : > { %v561_v12 = vmul.f32 %v537_v11, %v1078_v13  ;;  %v562_v9 = vmul.f32 %v537_v11, %v1080_v14 }
 0x1ea   : > { %573 = vst [vmem:[%s1208_s5 + $0x10] sm:$0xff] %v561_v12 }
 0x1eb   : > { %574 = vst [vmem:[%s1208_s5 + $0x18] sm:$0xff] %v562_v9 }
 0x1ef   : > { %v552_v5 = vpop.permute.xlu1 %551 }
 0x1f0   : > { %v567_v6 = vmul.f32 %v552_v5, %v1052_v0  ;;  %v568_v10 = vmul.f32 %v552_v5, %v1054_v1 }
 0x1f2   : > { %579 = vst [vmem:[%s1208_s5 + $0x40] sm:$0xff] %v567_v6 }
 0x1f3   : > { %580 = vst [vmem:[%s1208_s5 + $0x48] sm:$0xff] %v568_v10 }
 0x1f4   : > { %874 = shalt.err (!%p871_p8)
}
 0x1f5   : > { %s924_s4 = smov 256   ;;  %s925_s8 = smov 16  }
 0x1f6   : > { %706 = dma.vmem_to_hbm [thread:$0]  (%p993_p11), %s597_s24, 1536, %s599_s25, %s584_s13, %s924_s4, %s924_s4, %s925_s8  }
 0x1f7 PF: > { %s613_s20 = sand.u32 1, %s905_s9   ;;  %p1275_p9 = scmp.ge.s32.totalorder %s917_s12, 2 }
 0x1f8   : > { %s614_s23 = scalar_lea.sflag [#allocation5], %s613_s20 }
 0x1f9   : > { %p717_p10 = pnand %p1275_p9, %p997_p12 }
 0x1fb   : > { %p718_p1 = pneg %p717_p10 }
 0x1fd   : > { %900 = dma.done.wait (%p718_p1), %s614_s23, 1536  }
 0x1fe   : > { %902 = vsyncadd (%p718_p1), %s614_s23, 4294965760  ;;  %p16_p2 = scmp.ge.s32.totalorder %s966_s15, 4   ;;  %s1276_s9 = smov %s909_s10 }
 0x1ff   : > { %s1277_s10 = smov %s913_s11  ;;  %s1278_s11 = smov %s978_s18 }
 0x200   : > { %s1279_s12 = smov %s966_s15  ;;  %18 = sbr.rel (!%p16_p2) target bundleno = 6 (0x6), region = 78 }
 0x205   :  { %620 = vsyncpa [#allocation4], 1 }
 0x206   :  { %622 = vsyncpa [#allocation4 + $0x1], 1 }
 0x207   :  { %623 = vsyncpa [#allocation5], 1 }
 0x208   :  { %625 = vsyncpa [#allocation5 + $0x1], 1 }
 0x209   :  { %626 = vsyncpa [#allocation6], 1 }
 0x20a   :  { %628 = vsyncpa [#allocation6 + $0x1], 1 }

</bundles_post_ra>
